<compile_context>
chip_gen: v7x
topology: tpu7x:2x2x1
jax: 0.10.0
libtpu: 0.0.40
codegen_flags: <defaults>
</compile_context>

<pallas_src>
from functools import partial

import numpy as np
import jax
import jax.numpy as jnp
from jax.experimental import pallas as pl
from jax.experimental.pallas import tpu as pltpu


# ---------------------------------------------------------------------------
# Shared-range-reduction sincos (valid for |arg| up to ~1e5, plenty for
# |x * W * 2pi| with x in (0,1] and W ~ N(0, scale^2)).
# ---------------------------------------------------------------------------
_TWO_OVER_PI = 0.6366197723675814
# Cody–Waite split of pi/2 (first term has trailing zero bits -> k*PIO2_1 exact).
_PIO2_1 = 1.5703125
_PIO2_2 = 4.837512969970703125e-4
_PIO2_3 = 7.549782630657e-8
# Cephes single-precision minimax coefficients on [-pi/4, pi/4].
_SIN_C1 = -1.6666654611e-1
_SIN_C2 = 8.3321608736e-3
_SIN_C3 = -1.9515295891e-4
_COS_C1 = 4.166664568298827e-2
_COS_C2 = -1.388731625493765e-3
_COS_C3 = 2.443315711809948e-5


def _sincos(x):
    """Returns (sin(x), cos(x)) with one shared quadrant/range reduction."""
    kf = jnp.round(x * _TWO_OVER_PI)          # nearest multiple of pi/2
    q = kf.astype(jnp.int32)                  # quadrant (mod 4 via bit ops)
    r = x - kf * _PIO2_1
    r = r - kf * _PIO2_2
    r = r - kf * _PIO2_3                      # |r| <= pi/4
    z = r * r
    sin_r = r * (1.0 + z * (_SIN_C1 + z * (_SIN_C2 + z * _SIN_C3)))
    cos_r = 1.0 - 0.5 * z + (z * z) * (_COS_C1 + z * (_COS_C2 + z * _COS_C3))
    # Quadrant selection (two's-complement & gives proper mod-4 residue).
    swap = (q & 1) == 1
    sin_b = jnp.where(swap, cos_r, sin_r)
    cos_b = jnp.where(swap, sin_r, cos_r)
    sin_neg = (q & 2) == 2                    # quadrants 2,3 negate sin
    cos_neg = ((q + 1) & 2) == 2              # quadrants 1,2 negate cos
    sin_x = jnp.where(sin_neg, -sin_b, sin_b)
    cos_x = jnp.where(cos_neg, -cos_b, cos_b)
    return sin_x, cos_x


# ---------------------------------------------------------------------------
# Kernel
# ---------------------------------------------------------------------------
def _gfp_kernel(x_ref, w_ref, out_ref, *, half, split_store):
    # x_ref: (TB, 1), w_ref: (1, half) with 2*pi already folded in,
    # out_ref: (TB, 2*half)
    proj = x_ref[...] * w_ref[...]            # (TB, half) via broadcast
    sin_p, cos_p = _sincos(proj)
    if split_store:
        # half is a multiple of 128: two static, lane-aligned, unmasked stores;
        # no concatenated temp is materialized.
        out_ref[:, :half] = sin_p.astype(out_ref.dtype)
        out_ref[:, half:] = cos_p.astype(out_ref.dtype)
    else:
        # Lane-unaligned half: stitch once in-register, single full-block store.
        out_ref[...] = jnp.concatenate([sin_p, cos_p], axis=-1).astype(out_ref.dtype)


def _round_up(v, m):
    return ((v + m - 1) // m) * m


def gaussian_fourier_projection(x, w_premul, *, block_b=4096, out_dtype=None,
                                min_pallas_elements=65536):
    """Gaussian Fourier time embedding.

    x:        (B,) float32 time steps.
    w_premul: (embed_dim//2,) fixed weights with 2*pi already folded in
              (i.e. W * 2*pi, where W = randn(embed_dim//2) * scale).
    Returns (B, embed_dim) = concat([sin(x*W*2pi), cos(x*W*2pi)], axis=-1).
    """
    B = x.shape[0]
    half = w_premul.shape[0]
    embed_dim = 2 * half
    out_dtype = jnp.dtype(jnp.float32 if out_dtype is None else out_dtype)

    # Tiny problems: pure launch/DMA overhead as a kernel -- let XLA fuse the
    # plain expression into whatever consumes the embedding.
    if B * embed_dim < min_pallas_elements:
        proj = x[:, None].astype(jnp.float32) * w_premul[None, :].astype(jnp.float32)
        return jnp.concatenate([jnp.sin(proj), jnp.cos(proj)], axis=-1).astype(out_dtype)

    # Sublane multiple for the output dtype (f32: 8, bf16: 16, int8/fp8: 32).
    sub = {4: 8, 2: 16, 1: 32}[out_dtype.itemsize]

    if B <= block_b:
        # Split into >=2 parallel steps so both TensorCores on v7x get work.
        tb = _round_up(pl.cdiv(B, 2), sub)
        if tb >= B:
            tb = B                                   # too small to split
    else:
        tb = max(sub, (block_b // sub) * sub)

    x2d = x.reshape(B, 1).astype(jnp.float32)
    w2d = w_premul.reshape(1, half).astype(jnp.float32)

    kernel = partial(_gfp_kernel, half=half, split_store=(half % 128 == 0))

    out = pl.pallas_call(
        kernel,
        out_shape=jax.ShapeDtypeStruct((B, embed_dim), out_dtype),
        grid_spec=pl.GridSpec(
            grid=(pl.cdiv(B, tb),),
            in_specs=[
                pl.BlockSpec((tb, 1), lambda i: (i, 0)),      # batch tile of x
                pl.BlockSpec((1, half), lambda i: (0, 0)),    # W resident in VMEM
            ],
            out_specs=pl.BlockSpec((tb, embed_dim), lambda i: (i, 0)),
        ),
        compiler_params=pltpu.CompilerParams(
            dimension_semantics=("parallel",),
        ),
    )(x2d, w2d)
    return out


def gaussian_fourier_projection_ref(x, W):
    # Reference in the original (un-folded) formulation of the torch module.
    x_proj = x[:, None] * W[None, :] * 2.0 * np.pi
    return jnp.concatenate([jnp.sin(x_proj), jnp.cos(x_proj)], axis=-1)


if __name__ == "__main__":
    key = jax.random.PRNGKey(0)
    k_w, k_x = jax.random.split(key)

    scale = 30.0

    # ---- Pallas-kernel path: lane-aligned half (=128), >=2 parallel steps ----
    embed_dim = 256
    batch = 128

    W = jax.random.normal(k_w, (embed_dim // 2,), dtype=jnp.float32) * scale
    W_premul = W * (2.0 * np.pi)   # fold 2*pi into the fixed parameter once
    x = jax.random.uniform(k_x, (batch,), dtype=jnp.float32, minval=1e-3, maxval=1.0)

    out = gaussian_fourier_projection(x, W_premul, min_pallas_elements=0)
    out = jax.block_until_ready(out)

    ref = gaussian_fourier_projection_ref(x, W)
    assert out.shape == (batch, embed_dim)
    # Tolerance covers fp32 rounding of the large sin/cos arguments (the 2*pi
    # fold + product rounding give ~|arg|*2^-23 phase error) and the custom
    # range-reduced polynomial evaluation.
    np.testing.assert_allclose(np.asarray(out), np.asarray(ref), rtol=1e-4, atol=1e-3)

    # ---- Tiny case (the SDE demo's batch=8, embed_dim=64): XLA fallback ----
    embed_small = 64
    W_small = W[: embed_small // 2]
    x_small = x[:8]
    out_small = jax.block_until_ready(
        gaussian_fourier_projection(x_small, W_small * (2.0 * np.pi)))
    ref_small = gaussian_fourier_projection_ref(x_small, W_small)
    assert out_small.shape == (8, embed_small)
    np.testing.assert_allclose(np.asarray(out_small), np.asarray(ref_small),
                               rtol=1e-4, atol=1e-3)

    print("KERNEL_OK")
</pallas_src>

<mosaic_0001>
module attributes {stable_mosaic.version = 11 : i64} {
  func.func @_gfp_kernel(%arg0: i32, %arg1: memref<64x1xf32, #tpu.memory_space<vmem>>, %arg2: memref<1x128xf32, #tpu.memory_space<vmem>>, %arg3: memref<64x256xf32, #tpu.memory_space<vmem>>) attributes {dimension_semantics = [#tpu.dimension_semantics<parallel>], iteration_bounds = array<i64: 2>, scalar_prefetch = 0 : i64, scratch_operands = 0 : i64, tpu.core_type = #tpu.core_type<tc>, window_params = [{transform_indices = @transform_0, window_bounds = array<i64: 64, 1>}, {pipeline_mode = #tpu.pipeline_mode<synchronous>, transform_indices = @transform_1, window_bounds = array<i64: 1, 128>}, {transform_indices = @transform_2, window_bounds = array<i64: 64, 256>}]} {
    %c0 = arith.constant 0 : index
    %c0_0 = arith.constant 0 : index
    %0 = vector.load %arg1[%c0, %c0_0] : memref<64x1xf32, #tpu.memory_space<vmem>>, vector<64x1xf32>
    %c0_1 = arith.constant 0 : index
    %c0_2 = arith.constant 0 : index
    %1 = vector.load %arg2[%c0_1, %c0_2] : memref<1x128xf32, #tpu.memory_space<vmem>>, vector<1x128xf32>
    %2 = vector.broadcast %0 : vector<64x1xf32> to vector<64x128xf32>
    %3 = vector.broadcast %1 : vector<1x128xf32> to vector<64x128xf32>
    %4 = arith.mulf %2, %3 : vector<64x128xf32>
    %cst = arith.constant 0.636619746 : f32
    %5 = vector.broadcast %cst : f32 to vector<64x128xf32>
    %6 = arith.mulf %4, %5 : vector<64x128xf32>
    %7 = math.roundeven %6 : vector<64x128xf32>
    %8 = arith.fptosi %7 : vector<64x128xf32> to vector<64x128xi32>
    %cst_3 = arith.constant 1.5703125 : f32
    %9 = vector.broadcast %cst_3 : f32 to vector<64x128xf32>
    %10 = arith.mulf %7, %9 : vector<64x128xf32>
    %11 = arith.subf %4, %10 : vector<64x128xf32>
    %cst_4 = arith.constant 4.83751297E-4 : f32
    %12 = vector.broadcast %cst_4 : f32 to vector<64x128xf32>
    %13 = arith.mulf %7, %12 : vector<64x128xf32>
    %14 = arith.subf %11, %13 : vector<64x128xf32>
    %cst_5 = arith.constant 7.54978231E-8 : f32
    %15 = vector.broadcast %cst_5 : f32 to vector<64x128xf32>
    %16 = arith.mulf %7, %15 : vector<64x128xf32>
    %17 = arith.subf %14, %16 : vector<64x128xf32>
    %18 = arith.mulf %17, %17 : vector<64x128xf32>
    %cst_6 = arith.constant -1.95152956E-4 : f32
    %19 = vector.broadcast %cst_6 : f32 to vector<64x128xf32>
    %20 = arith.mulf %18, %19 : vector<64x128xf32>
    %cst_7 = arith.constant 0.00833216123 : f32
    %21 = vector.broadcast %cst_7 : f32 to vector<64x128xf32>
    %22 = arith.addf %21, %20 : vector<64x128xf32>
    %23 = arith.mulf %18, %22 : vector<64x128xf32>
    %cst_8 = arith.constant -0.166666552 : f32
    %24 = vector.broadcast %cst_8 : f32 to vector<64x128xf32>
    %25 = arith.addf %24, %23 : vector<64x128xf32>
    %26 = arith.mulf %18, %25 : vector<64x128xf32>
    %cst_9 = arith.constant 1.000000e+00 : f32
    %27 = vector.broadcast %cst_9 : f32 to vector<64x128xf32>
    %28 = arith.addf %27, %26 : vector<64x128xf32>
    %29 = arith.mulf %17, %28 : vector<64x128xf32>
    %cst_10 = arith.constant 5.000000e-01 : f32
    %30 = vector.broadcast %cst_10 : f32 to vector<64x128xf32>
    %31 = arith.mulf %30, %18 : vector<64x128xf32>
    %cst_11 = arith.constant 1.000000e+00 : f32
    %32 = vector.broadcast %cst_11 : f32 to vector<64x128xf32>
    %33 = arith.subf %32, %31 : vector<64x128xf32>
    %34 = arith.mulf %18, %18 : vector<64x128xf32>
    %cst_12 = arith.constant 2.44331568E-5 : f32
    %35 = vector.broadcast %cst_12 : f32 to vector<64x128xf32>
    %36 = arith.mulf %18, %35 : vector<64x128xf32>
    %cst_13 = arith.constant -0.00138873165 : f32
    %37 = vector.broadcast %cst_13 : f32 to vector<64x128xf32>
    %38 = arith.addf %37, %36 : vector<64x128xf32>
    %39 = arith.mulf %18, %38 : vector<64x128xf32>
    %cst_14 = arith.constant 0.0416666456 : f32
    %40 = vector.broadcast %cst_14 : f32 to vector<64x128xf32>
    %41 = arith.addf %40, %39 : vector<64x128xf32>
    %42 = arith.mulf %34, %41 : vector<64x128xf32>
    %43 = arith.addf %33, %42 : vector<64x128xf32>
    %c1_i32 = arith.constant 1 : i32
    %44 = vector.broadcast %c1_i32 : i32 to vector<64x128xi32>
    %45 = arith.andi %8, %44 : vector<64x128xi32>
    %c1_i32_15 = arith.constant 1 : i32
    %46 = vector.broadcast %c1_i32_15 : i32 to vector<64x128xi32>
    %47 = arith.cmpi eq, %45, %46 : vector<64x128xi32>
    %48 = arith.select %47, %43, %29 : vector<64x128xi1>, vector<64x128xf32>
    %49 = arith.select %47, %29, %43 : vector<64x128xi1>, vector<64x128xf32>
    %c2_i32 = arith.constant 2 : i32
    %50 = vector.broadcast %c2_i32 : i32 to vector<64x128xi32>
    %51 = arith.andi %8, %50 : vector<64x128xi32>
    %c2_i32_16 = arith.constant 2 : i32
    %52 = vector.broadcast %c2_i32_16 : i32 to vector<64x128xi32>
    %53 = arith.cmpi eq, %51, %52 : vector<64x128xi32>
    %c1_i32_17 = arith.constant 1 : i32
    %54 = vector.broadcast %c1_i32_17 : i32 to vector<64x128xi32>
    %55 = arith.addi %8, %54 : vector<64x128xi32>
    %c2_i32_18 = arith.constant 2 : i32
    %56 = vector.broadcast %c2_i32_18 : i32 to vector<64x128xi32>
    %57 = arith.andi %55, %56 : vector<64x128xi32>
    %c2_i32_19 = arith.constant 2 : i32
    %58 = vector.broadcast %c2_i32_19 : i32 to vector<64x128xi32>
    %59 = arith.cmpi eq, %57, %58 : vector<64x128xi32>
    %cst_20 = arith.constant 0.000000e+00 : f32
    %60 = vector.broadcast %cst_20 : f32 to vector<64x128xf32>
    %61 = arith.subf %60, %48 : vector<64x128xf32>
    %62 = arith.select %53, %61, %48 : vector<64x128xi1>, vector<64x128xf32>
    %cst_21 = arith.constant 0.000000e+00 : f32
    %63 = vector.broadcast %cst_21 : f32 to vector<64x128xf32>
    %64 = arith.subf %63, %49 : vector<64x128xf32>
    %65 = arith.select %59, %64, %49 : vector<64x128xi1>, vector<64x128xf32>
    %c0_22 = arith.constant 0 : index
    %c0_23 = arith.constant 0 : index
    %66 = vector.load %arg3[%c0_22, %c0_23] : memref<64x256xf32, #tpu.memory_space<vmem>>, vector<64x128xf32>
    tpu.vector_store %arg3[%c0_22, %c0_23], %62 {strides = array<i32>} : memref<64x256xf32, #tpu.memory_space<vmem>>, vector<64x128xf32>,
    %c0_24 = arith.constant 0 : index
    %c128 = arith.constant 128 : index
    %67 = vector.load %arg3[%c0_24, %c128] : memref<64x256xf32, #tpu.memory_space<vmem>>, vector<64x128xf32>
    tpu.vector_store %arg3[%c0_24, %c128], %65 {strides = array<i32>} : memref<64x256xf32, #tpu.memory_space<vmem>>, vector<64x128xf32>,
    return
  }
  func.func @transform_0(%arg0: i32) -> (i32, i32) {
    %c0_i32 = arith.constant 0 : i32
    %c0_i32_0 = arith.constant 0 : i32
    return %arg0, %c0_i32 : i32, i32
  }
  func.func @transform_1(%arg0: i32) -> (i32, i32) {
    %c0_i32 = arith.constant 0 : i32
    %c0_i32_0 = arith.constant 0 : i32
    %c0_i32_1 = arith.constant 0 : i32
    return %c0_i32, %c0_i32_0 : i32, i32
  }
  func.func @transform_2(%arg0: i32) -> (i32, i32) {
    %c0_i32 = arith.constant 0 : i32
    %c0_i32_0 = arith.constant 0 : i32
    return %arg0, %c0_i32 : i32, i32
  }
}

</mosaic_0001>

<bundles_post_ra>
// kernel: tpu_custom_call.1
= control target key start
LH: loop header
LB: loop body
LE: loop exit
PB: predicated region body
PF: predicated region fallthrough
CT: control target
= control target key end

     0   :  { %7 = vsyncpa [#allocation3], 0  ;;  %s1082_s0 = inlined_call_operand.vmem [shape: f32[128,1], index: 0, kind: input, shape index: {}]   ;;  %s1083_s1 = inlined_call_operand.vmem [shape: f32[1,128], index: 1, kind: input, shape index: {}]   ;;  %s1084_s2 = inlined_call_operand.hbm [shape: f32[128,256], index: 2, kind: output, shape index: {}]  }
   0x1   :  { %9 = vsyncpa [#allocation3 + $0x1], 0  ;;  %s788_s9 = smov 0   ;;  %s790_s10 = smov 0  }
   0x2   :  { %s792_s11 = smov 0   ;;  %s794_s12 = smov 0  }
   0x3 LB: > { %s809_s13 = sadd.s32 4294967295, %s767_s12   ;;  %s613_s14 = sadd.s32 4294967294, %s767_s12   ;;  %s767_s12 = sphi %s794_s12, %s1116_s12   ;;  %s763_s11 = sphi %s792_s11, %s1115_s11   ;;  %s759_s10 = sphi %s790_s10, %s1114_s10   ;;  %s755_s9 = sphi %s788_s9, %s1113_s9  }
   0x4   : > { %s813_s15 = sadd.s32 1, %s767_s12   ;;  %s69_s16 = sadd.s32 1, %s763_s11 }
   0x5   : > { %s66_s17 = ssub.s32 %s767_s12, %s813_s15  ;;  %p79_p0 = scmp.ne.s32.totalorder %s763_s11, %s759_s10 }
   0x6   : > { %p67_p1 = scmp.eq.s32.totalorder %s66_s17, 0  ;;  %p80_p2 = scmp.eq.s32.totalorder %s809_s13, 1 }
   0x7   : > { %p85_p3 = scmp.ne.s32.totalorder %s759_s10, %s755_s9  ;;  %p86_p4 = scmp.eq.s32.totalorder %s613_s14, 1 }
   0x8   : > { %s824_s18 = scalar_select %p67_p1, %s763_s11, %s69_s16  }
   0x9   : > { %p826_p5 = por %p80_p2, %p79_p0  ;;  %p830_p6 = por %p86_p4, %p85_p3 }
   0xa   : > { %p616_p7 = scmp.ge.s32.totalorder %s767_s12, 1  ;;  %p116_p8 = scmp.lt.s32.totalorder %s767_s12, 3 }
   0xc   : > { %p117_p9 = pnand %p616_p7, %p116_p8 }
   0xd   : > { %s618_s21 = sshll.u32 (!%p117_p9), %s809_s13, 3  ;;  %v769_v0 = vmov (!%p117_p9), 0   ;;  %v843_v9 = vld [vmem:[%s1083_s1] ss:$0 sm:$0xff] (!%p117_p9)  ;;  %s135_s28 = sand.u32 (!%p117_p9), 1, %s759_s10  }
   0xe   : > { %120 = sbr.rel (%p117_p9) target bundleno = 259 (0x103), region = 28  ;;  %704 = vset.pattern.permute.xlu1 (!%p117_p9), %v769_v0  ;;  %703 = vset.pattern.permute.xlu0 (!%p117_p9), %v769_v0  ;;  %p139_p10 = scmp.lt.s32.totalorder (!%p117_p9), %s618_s21, 15 }
   0xf   : > { %s617_s29 = sshll.u32 (!%p117_p9), %s135_s28, 7  ;;  %s628_s3 = sshll.u32 (!%p117_p9), %s809_s13, 11 }
  0x10   : > { %s933_s30 = scalar_lea.vmem (!%p117_p9), [#allocation2], %s617_s29  ;;  %s1033_s7 = scalar_lea.hbm (!%p117_p9), %s1084_s2, %s628_s3 }
  0x11   : > { %s551_s4 = sshll.u32 (!%p117_p9), %s933_s30, 4  ;;  %s1041_s8 = scalar_lea.sflag (!%p117_p9), [#allocation3], %s135_s28  ;;  %s1035_s4 = int_to_ptr.vmem [resolvable:$true] %s551_s4 }
  0x12   : > { %s705_s13 = scalar_lea.vmem (!%p117_p9), %s1035_s4, 2048  ;;  %s770_s14 = smov (!%p117_p9), [#allocation2]  }
  0x13   : > { %p706_p11 = scmp.ne.s32.totalorder (!%p117_p9), %s1035_s4, %s705_s13  ;;  %s709_s16 = sshll.u32 (!%p117_p9), %s770_s14, 4  ;;  %s710_s16 = int_to_ptr.vmem [resolvable:$false] %s709_s16 }
  0x14   : > { %s711_s17 = scalar_lea.vmem (!%p117_p9), %s710_s16, 4096  ;;  %p712_p0 = scmp.lt.s32.totalorder (!%p117_p9), %s1035_s4, %s710_s16 }
  0x15   : > { %s1118_s21 = smov (!%p139_p10, %s618_s21), 15  ;;  %p707_p12 = pnand %p706_p11, %p826_p5 }
  0x16   : > { %s619_s22 = sshll.u32 %s1118_s21, 3  ;;  %p713_p1 = scmp.lt.s32.totalorder %s711_s17, %s705_s13 }
  0x17   : > { %s142_s25 = scalar_lea.vmem %s1082_s0, %s619_s22  ;;  %p708_p13 = pneg %p707_p12 }
  0x18   : > { %v147_v1 = vld [vmem:[%s142_s25 + $0x10] sm:$0xff]  ;;  %v145_v2 = vld [vmem:[%s142_s25] sm:$0xff]  ;;  %v148_v3 = vld [vmem:[%s142_s25 + $0x18] sm:$0xff]  ;;  %p714_p2 = por %p713_p1, %p712_p0 }
  0x19   : > { %166 = vperm.xlu1 %704, %v147_v1   ;;  %156 = vperm.xlu0 %703, %v145_v2   ;;  %v146_v4 = vld [vmem:[%s142_s25 + $0x8] sm:$0xff]  ;;  %v149_v6 = vld [vmem:[%s142_s25 + $0x20] sm:$0xff]  ;;  %v152_v7 = vld [vmem:[%s142_s25 + $0x38] sm:$0xff] }
  0x1a   : > { %v150_v5 = vld [vmem:[%s142_s25 + $0x28] sm:$0xff]  ;;  %v151_v8 = vld [vmem:[%s142_s25 + $0x30] sm:$0xff]  ;;  %p715_p3 = pnand %p714_p2, %p708_p13 }
  0x1d   : > { %171 = vperm.xlu1 %704, %v148_v3   ;;  %161 = vperm.xlu0 %703, %v146_v4  }
  0x21   : > { %181 = vperm.xlu1 %704, %v150_v5   ;;  %176 = vperm.xlu0 %703, %v149_v6  }
  0x25   : > { %191 = vperm.xlu1 %704, %v152_v7   ;;  %186 = vperm.xlu0 %703, %v151_v8  }
  0x98   : > { %v167_v10 = vpop.permute.xlu1 %166  ;;  %v157_v11 = vpop.permute.xlu0 %156 }
  0x99   : > { %v202_v12 = vmul.f32 %v843_v9, %v167_v10  ;;  %v200_v13 = vmul.f32 %v843_v9, %v157_v11 }
  0x9b   : > { %v210_v14 = vmul.f32 0.63661975, %v202_v12  ;;  %v208_v15 = vmul.f32 0.63661975, %v200_v13 }
  0x9c   : > { %v172_v16 = vpop.permute.xlu1 %171  ;;  %v162_v21 = vpop.permute.xlu0 %161 }
  0x9d   : > { %v631_v17 = vround.rtne.f32 %v210_v14  ;;  %v629_v18 = vround.rtne.f32 %v208_v15  ;;  %v203_v20 = vmul.f32 %v843_v9, %v172_v16  ;;  %v848_v22 = vcvt.f32.s32 %v210_v14 }
  0x9e   : > { %v850_v26 = vcvt.f32.s32 %v208_v15  ;;  %v853_v29 = vmul.f32 %v843_v9, %v162_v21 }
  0x9f   : > { %v234_v19 = vmul.f32 1.5703125, %v631_v17  ;;  %v232_v23 = vmul.f32 1.5703125, %v629_v18  ;;  %v250_v25 = vmul.f32 0.0004837513, %v631_v17  ;;  %v248_v28 = vmul.f32 0.0004837513, %v629_v18 }
  0xa0   : > { %v266_v31 = vmul.f32 7.549782e-08, %v631_v17  ;;  %v211_v32 = vmul.f32 0.63661975, %v203_v20  ;;  %v466_v33 = vadd.s32 1, %v848_v22  ;;  %v464_v37 = vadd.s32 1, %v850_v26  ;;  %v182_v53 = vpop.permute.xlu1 %181 }
  0xa1   : > { %v242_v24 = vsub.f32 %v202_v12, %v234_v19  ;;  %v240_v27 = vsub.f32 %v200_v13, %v232_v23  ;;  %v264_v35 = vmul.f32 7.549782e-08, %v629_v18  ;;  %v862_v40 = vmul.f32 0.63661975, %v853_v29 }
  0xa2   : > { %v632_v38 = vround.rtne.f32 %v211_v32  ;;  %v418_v42 = vand.u32 1, %v848_v22  ;;  %v450_v43 = vand.u32 2, %v848_v22  ;;  %v474_v45 = vand.u32 2, %v466_v33 }
  0xa3   : > { %v258_v30 = vsub.f32 %v242_v24, %v250_v25  ;;  %v256_v34 = vsub.f32 %v240_v27, %v248_v28  ;;  %v416_v47 = vand.u32 1, %v850_v26  ;;  %v448_v48 = vand.u32 2, %v850_v26 }
  0xa4   : > { %v235_v44 = vmul.f32 1.5703125, %v632_v38  ;;  %v472_v51 = vand.u32 2, %v464_v37  ;;  %v872_v52 = vcvt.f32.s32 %v211_v32  ;;  %v251_v56 = vmul.f32 0.0004837513, %v632_v38 }
  0xa5   : > { %v856_v36 = vsub.f32 %v258_v30, %v266_v31  ;;  %v859_v39 = vsub.f32 %v256_v34, %v264_v35  ;;  %v630_v57 = vround.rtne.f32 %v862_v40  ;;  %v267_v61 = vmul.f32 7.549782e-08, %v632_v38 }
  0xa6   : > { %v243_v60 = vsub.f32 %v203_v20, %v235_v44  ;;  %v876_v1 = vmul.f32 %v843_v9, %v182_v53  ;;  %vm878_vm0 = vcmp.eq.s32.totalorder %v418_v42, 1  ;;  %vm882_vm1 = vcmp.eq.s32.totalorder %v416_v47, 1 }
  0xa7   : > { %v282_v41 = vmul.f32 %v856_v36, %v856_v36  ;;  %v280_v46 = vmul.f32 %v859_v39, %v859_v39  ;;  %v233_v11 = vmul.f32 1.5703125, %v630_v57  ;;  %v249_v20 = vmul.f32 0.0004837513, %v630_v57 }
  0xa8   : > { %v259_v5 = vsub.f32 %v243_v60, %v251_v56  ;;  %vm889_vm2 = vcmp.eq.s32.totalorder %v450_v43, 2  ;;  %vm893_vm3 = vcmp.eq.s32.totalorder %v474_v45, 2  ;;  %v419_v26 = vand.u32 1, %v872_v52 }
  0xa9   : > { %v290_v49 = vmul.f32 -0.00019515296, %v282_v41  ;;  %v370_v50 = vmul.f32 2.4433157e-05, %v282_v41  ;;  %v288_v54 = vmul.f32 -0.00019515296, %v280_v46  ;;  %v362_v3 = vmul.f32 %v282_v41, %v282_v41 }
  0xaa   : > { %v368_v55 = vmul.f32 2.4433157e-05, %v280_v46  ;;  %v346_v62 = vmul.f32 0.5, %v282_v41  ;;  %v344_v8 = vmul.f32 0.5, %v280_v46  ;;  %v360_v14 = vmul.f32 %v280_v46, %v280_v46 }
  0xab   : > { %v298_v58 = vadd.f32 0.008332161, %v290_v49  ;;  %v378_v59 = vadd.f32 -0.0013887316, %v370_v50  ;;  %v296_v63 = vadd.f32 0.008332161, %v288_v54  ;;  %v886_v16 = vsub.f32 %v259_v5, %v267_v61 }
  0xac   : > { %v376_v0 = vadd.f32 -0.0013887316, %v368_v55  ;;  %v241_v19 = vsub.f32 %v853_v29, %v233_v11  ;;  %vm901_vm4 = vcmp.eq.s32.totalorder %v448_v48, 2  ;;  %vm905_vm5 = vcmp.eq.s32.totalorder %v472_v51, 2 }
  0xad   : > { %v306_v2 = vmul.f32 %v298_v58, %v282_v41  ;;  %v386_v4 = vmul.f32 %v378_v59, %v282_v41  ;;  %v304_v7 = vmul.f32 %v296_v63, %v280_v46  ;;  %v283_v25 = vmul.f32 %v886_v16, %v886_v16 }
  0xae   : > { %v384_v10 = vmul.f32 %v376_v0, %v280_v46  ;;  %v451_v31 = vand.u32 2, %v872_v52  ;;  %v257_v32 = vsub.f32 %v241_v19, %v249_v20  ;;  %v354_v34 = vsub.f32 1.0, %v346_v62 }
  0xaf   : > { %v314_v12 = vadd.f32 -0.16666655, %v306_v2  ;;  %v394_v13 = vadd.f32 0.041666646, %v386_v4  ;;  %v312_v17 = vadd.f32 -0.16666655, %v304_v7  ;;  %v363_v0 = vmul.f32 %v283_v25, %v283_v25 }
  0xb0   : > { %v392_v18 = vadd.f32 0.041666646, %v384_v10  ;;  %v291_v35 = vmul.f32 -0.00019515296, %v283_v25  ;;  %v265_v37 = vmul.f32 7.549782e-08, %v630_v57 }
  0xb1   : > { %v322_v21 = vmul.f32 %v314_v12, %v282_v41  ;;  %v402_v22 = vmul.f32 %v394_v13, %v362_v3  ;;  %v320_v27 = vmul.f32 %v312_v17, %v280_v46  ;;  %v352_v41 = vsub.f32 1.0, %v344_v8  ;;  %v177_v12 = vpop.permute.xlu0 %176 }
  0xb2   : > { %v400_v28 = vmul.f32 %v392_v18, %v360_v14  ;;  %v371_v42 = vmul.f32 2.4433157e-05, %v283_v25  ;;  %v911_v43 = vadd.s32 1, %v872_v52  ;;  %v299_v46 = vadd.f32 0.008332161, %v291_v35 }
  0xb3   : > { %v330_v33 = vadd.f32 1.0, %v322_v21  ;;  %v328_v38 = vadd.f32 1.0, %v320_v27  ;;  %v410_v45 = vadd.f32 %v402_v22, %v354_v34  ;;  %v916_v47 = vsub.f32 %v257_v32, %v265_v37 }
  0xb4   : > { %v408_v49 = vadd.f32 %v400_v28, %v352_v41  ;;  %v347_v50 = vmul.f32 0.5, %v283_v25  ;;  %v379_v51 = vadd.f32 -0.0013887316, %v371_v42  ;;  %v307_v54 = vmul.f32 %v299_v46, %v283_v25 }
  0xb5   : > { %v338_v44 = vmul.f32 %v330_v33, %v856_v36  ;;  %v336_v48 = vmul.f32 %v328_v38, %v859_v39  ;;  %v281_v55 = vmul.f32 %v916_v47, %v916_v47  ;;  %vm943_vm6 = vcmp.eq.s32.totalorder %v419_v26, 1 }
  0xb6   : > { %v315_v60 = vadd.f32 -0.16666655, %v307_v54  ;;  %v387_v61 = vmul.f32 %v379_v51, %v283_v25  ;;  %v642_v8 = vcvt.f32.s32 %v862_v40  ;;  %v355_v14 = vsub.f32 1.0, %v347_v50  ;;  %v192_v50 = vpop.permute.xlu1 %191 }
  0xb7   : > { %v434_v53 = vsel %vm878_vm0, %v410_v45, %v338_v44  ;;  %v442_v52 = vsel %vm878_vm0, %v338_v44, %v410_v45  ;;  %v432_v57 = vsel %vm882_vm1, %v408_v49, %v336_v48  ;;  %v440_v39 = vsel %vm882_vm1, %v336_v48, %v408_v49 }
  0xb8   : > { %v490_v36 = vsub.f32 0.0, %v434_v53  ;;  %v506_v56 = vsub.f32 0.0, %v442_v52  ;;  %v488_v58 = vsub.f32 0.0, %v432_v57  ;;  %v504_v59 = vsub.f32 0.0, %v440_v39 }
  0xb9   : > { %v289_v2 = vmul.f32 -0.00019515296, %v281_v55  ;;  %v323_v5 = vmul.f32 %v315_v60, %v283_v25  ;;  %v395_v6 = vadd.f32 0.041666646, %v387_v61  ;;  %v369_v11 = vmul.f32 2.4433157e-05, %v281_v55 }
  0xba   : > { %v498_v62 = vsel %vm889_vm2, %v490_v36, %v434_v53  ;;  %v514_v63 = vsel %vm893_vm3, %v506_v56, %v442_v52  ;;  %v496_v3 = vsel %vm901_vm4, %v488_v58, %v432_v57  ;;  %v512_v4 = vsel %vm905_vm5, %v504_v59, %v440_v39 }
  0xbb   : > { %522 = vst [vmem:[%s933_s30 + $0x20] sm:$0xff] %v498_v62  ;;  %530 = vst [vmem:[%s933_s30 + $0x28] sm:$0xff] %v514_v63  ;;  %v297_v10 = vadd.f32 0.008332161, %v289_v2  ;;  %v331_v13 = vadd.f32 1.0, %v323_v5  ;;  %v403_v15 = vmul.f32 %v395_v6, %v363_v0  ;;  %vm948_vm7 = vcmp.eq.s32.totalorder %v451_v31, 2 }
  0xbc   : > { %520 = vst [vmem:[%s933_s30] sm:$0xff] %v496_v3  ;;  %528 = vst [vmem:[%s933_s30 + $0x8] sm:$0xff] %v512_v4  ;;  %v475_v18 = vand.u32 2, %v911_v43  ;;  %v377_v20 = vadd.f32 -0.0013887316, %v369_v11  ;;  %v213_v21 = vmul.f32 0.63661975, %v876_v1  ;;  %v204_v24 = vmul.f32 %v843_v9, %v177_v12 }
  0xbd   : > { %v305_v19 = vmul.f32 %v297_v10, %v281_v55  ;;  %v339_v22 = vmul.f32 %v331_v13, %v886_v16  ;;  %v411_v23 = vadd.f32 %v403_v15, %v355_v14  ;;  %v345_v40 = vmul.f32 0.5, %v281_v55  ;;  %v187_v15 = vpop.permute.xlu0 %186 }
  0xbe   : > { %v361_v26 = vmul.f32 %v281_v55, %v281_v55  ;;  %v385_v27 = vmul.f32 %v377_v20, %v281_v55  ;;  %v634_v28 = vround.rtne.f32 %v213_v21  ;;  %v465_v31 = vadd.s32 1, %v642_v8 }
  0xbf   : > { %v313_v25 = vadd.f32 -0.16666655, %v305_v19  ;;  %v435_v29 = vsel %vm943_vm6, %v411_v23, %v339_v22  ;;  %v443_v30 = vsel %vm943_vm6, %v339_v22, %v411_v23  ;;  %v212_v32 = vmul.f32 0.63661975, %v204_v24 }
  0xc0   : > { %v491_v33 = vsub.f32 0.0, %v435_v29  ;;  %v507_v16 = vsub.f32 0.0, %v443_v30  ;;  %v393_v35 = vadd.f32 0.041666646, %v385_v27  ;;  %vm483_vm8 = vcmp.eq.s32.totalorder %v475_v18, 2 }
  0xc1   : > { %v321_v34 = vmul.f32 %v313_v25, %v281_v55  ;;  %v353_v37 = vsub.f32 1.0, %v345_v40  ;;  %v417_v38 = vand.u32 1, %v642_v8  ;;  %v237_v41 = vmul.f32 1.5703125, %v634_v28 }
  0xc2   : > { %v499_v42 = vsel %vm948_vm7, %v491_v33, %v435_v29  ;;  %v515_v43 = vsel %vm483_vm8, %v507_v16, %v443_v30  ;;  %v401_v45 = vmul.f32 %v393_v35, %v361_v26  ;;  %v449_v46 = vand.u32 2, %v642_v8 }
  0xc3   : > { %v329_v44 = vadd.f32 1.0, %v321_v34  ;;  %523 = vst [vmem:[%s933_s30 + $0x30] sm:$0xff] %v499_v42  ;;  %531 = vst [vmem:[%s933_s30 + $0x38] sm:$0xff] %v515_v43  ;;  %v245_v48 = vsub.f32 %v876_v1, %v237_v41  ;;  %v253_v49 = vmul.f32 0.0004837513, %v634_v28  ;;  %v473_v52 = vand.u32 2, %v465_v31 }
  0xc4   : > { %v409_v53 = vadd.f32 %v401_v45, %v353_v37  ;;  %v633_v54 = vround.rtne.f32 %v212_v32  ;;  %vm425_vm9 = vcmp.eq.s32.totalorder %v417_v38, 1  ;;  %v269_v36 = vmul.f32 7.549782e-08, %v634_v28 }
  0xc5   : > { %v337_v51 = vmul.f32 %v329_v44, %v916_v47  ;;  %v261_v55 = vsub.f32 %v245_v48, %v253_v49  ;;  %v207_v58 = vmul.f32 %v843_v9, %v192_v50  ;;  %v654_v1 = vcvt.f32.s32 %v213_v21 }
  0xc6   : > { %v236_v39 = vmul.f32 1.5703125, %v633_v54  ;;  %vm457_vm10 = vcmp.eq.s32.totalorder %v449_v46, 2  ;;  %vm481_vm11 = vcmp.eq.s32.totalorder %v473_v52, 2  ;;  %v252_v62 = vmul.f32 0.0004837513, %v633_v54 }
  0xc7   : > { %v433_v56 = vsel %vm425_vm9, %v409_v53, %v337_v51  ;;  %v441_v57 = vsel %vm425_vm9, %v337_v51, %v409_v53  ;;  %v277_v61 = vsub.f32 %v261_v55, %v269_v36  ;;  %v268_v4 = vmul.f32 7.549782e-08, %v633_v54 }
  0xc8   : > { %v489_v59 = vsub.f32 0.0, %v433_v56  ;;  %v505_v60 = vsub.f32 0.0, %v441_v57  ;;  %v244_v47 = vsub.f32 %v204_v24, %v236_v39  ;;  %v969_v5 = vmul.f32 0.63661975, %v207_v58 }
  0xc9   : > { %v285_v2 = vmul.f32 %v277_v61, %v277_v61  ;;  %v469_v8 = vadd.s32 1, %v654_v1  ;;  %v421_v10 = vand.u32 1, %v654_v1  ;;  %v453_v17 = vand.u32 2, %v654_v1 }
  0xca   : > { %v497_v63 = vsel %vm457_vm10, %v489_v59, %v433_v56  ;;  %v513_v0 = vsel %vm481_vm11, %v505_v60, %v441_v57  ;;  %v260_v3 = vsub.f32 %v244_v47, %v252_v62  ;;  %v636_v12 = vround.rtne.f32 %v969_v5 }
  0xcb   : > { %521 = vst [vmem:[%s933_s30 + $0x10] sm:$0xff] %v497_v63  ;;  %529 = vst [vmem:[%s933_s30 + $0x18] sm:$0xff] %v513_v0  ;;  %v293_v6 = vmul.f32 -0.00019515296, %v285_v2  ;;  %v373_v7 = vmul.f32 2.4433157e-05, %v285_v2  ;;  %v974_v18 = vcvt.f32.s32 %v212_v32  ;;  %v365_v24 = vmul.f32 %v285_v2, %v285_v2 }
  0xcc   : > { %v971_v11 = vsub.f32 %v260_v3, %v268_v4  ;;  %v239_v20 = vmul.f32 1.5703125, %v636_v12  ;;  %v349_v22 = vmul.f32 0.5, %v285_v2  ;;  %v477_v40 = vand.u32 2, %v469_v8 }
  0xcd   : > { %v301_v13 = vadd.f32 0.008332161, %v293_v6  ;;  %v381_v14 = vadd.f32 -0.0013887316, %v373_v7  ;;  %vm978_vm12 = vcmp.eq.s32.totalorder %v421_v10, 1  ;;  %v206_v28 = vmul.f32 %v843_v9, %v187_v15 }
  0xce   : > { %v284_v19 = vmul.f32 %v971_v11, %v971_v11  ;;  %v247_v31 = vsub.f32 %v207_v58, %v239_v20  ;;  %v255_v32 = vmul.f32 0.0004837513, %v636_v12  ;;  %v420_v34 = vand.u32 1, %v974_v18 }
  0xcf   : > { %v309_v21 = vmul.f32 %v301_v13, %v285_v2  ;;  %v389_v23 = vmul.f32 %v381_v14, %v285_v2  ;;  %v452_v35 = vand.u32 2, %v974_v18  ;;  %vm985_vm13 = vcmp.eq.s32.totalorder %v453_v17, 2 }
  0xd0   : > { %v292_v26 = vmul.f32 -0.00019515296, %v284_v19  ;;  %v372_v27 = vmul.f32 2.4433157e-05, %v284_v19  ;;  %vm989_vm14 = vcmp.eq.s32.totalorder %v477_v40, 2  ;;  %v263_v9 = vsub.f32 %v247_v31, %v255_v32 }
  0xd1   : > { %v317_v29 = vadd.f32 -0.16666655, %v309_v21  ;;  %v397_v30 = vadd.f32 0.041666646, %v389_v23  ;;  %v271_v43 = vmul.f32 7.549782e-08, %v636_v12  ;;  %v364_v54 = vmul.f32 %v284_v19, %v284_v19 }
  0xd2   : > { %v300_v33 = vadd.f32 0.008332161, %v292_v26  ;;  %v380_v16 = vadd.f32 -0.0013887316, %v372_v27  ;;  %v468_v46 = vadd.s32 1, %v974_v18  ;;  %v357_v50 = vsub.f32 1.0, %v349_v22 }
  0xd3   : > { %v325_v37 = vmul.f32 %v317_v29, %v285_v2  ;;  %v405_v38 = vmul.f32 %v397_v30, %v365_v24  ;;  %v994_v48 = vmul.f32 0.63661975, %v206_v28  ;;  %v348_v51 = vmul.f32 0.5, %v284_v19 }
  0xd4   : > { %v308_v44 = vmul.f32 %v300_v33, %v284_v19  ;;  %v388_v45 = vmul.f32 %v380_v16, %v284_v19  ;;  %v279_v53 = vsub.f32 %v263_v9, %v271_v43  ;;  %vm997_vm15 = vcmp.eq.s32.totalorder %v420_v34, 1 }
  0xd5   : > { %v333_v49 = vadd.f32 1.0, %v325_v37  ;;  %v635_v36 = vround.rtne.f32 %v994_v48  ;;  %v413_v57 = vadd.f32 %v405_v38, %v357_v50  ;;  %v476_v1 = vand.u32 2, %v468_v46 }
  0xd6   : > { %v316_v52 = vadd.f32 -0.16666655, %v308_v44  ;;  %v396_v55 = vadd.f32 0.041666646, %v388_v45  ;;  %v287_v58 = vmul.f32 %v279_v53, %v279_v53  ;;  %v356_v0 = vsub.f32 1.0, %v348_v51 }
  0xd7   : > { %v341_v56 = vmul.f32 %v333_v49, %v277_v61  ;;  %v238_v47 = vmul.f32 1.5703125, %v635_v36  ;;  %v660_v6 = vcvt.f32.s32 %v969_v5  ;;  %v254_v12 = vmul.f32 0.0004837513, %v635_v36 }
  0xd8   : > { %v324_v59 = vmul.f32 %v316_v52, %v284_v19  ;;  %v404_v60 = vmul.f32 %v396_v55, %v364_v54  ;;  %v295_v61 = vmul.f32 -0.00019515296, %v287_v58  ;;  %v375_v10 = vmul.f32 2.4433157e-05, %v287_v58 }
  0xd9   : > { %v437_v62 = vsel %vm978_vm12, %v413_v57, %v341_v56  ;;  %v445_v63 = vsel %vm978_vm12, %v341_v56, %v413_v57  ;;  %v246_v17 = vsub.f32 %v206_v28, %v238_v47  ;;  %vm1013_vm0 = vcmp.eq.s32.totalorder %v452_v35, 2 }
  0xda   : > { %v493_v2 = vsub.f32 0.0, %v437_v62  ;;  %v509_v3 = vsub.f32 0.0, %v445_v63  ;;  %v332_v4 = vadd.f32 1.0, %v324_v59  ;;  %v412_v7 = vadd.f32 %v404_v60, %v356_v0 }
  0xdb   : > { %v303_v8 = vadd.f32 0.008332161, %v295_v61  ;;  %v351_v19 = vmul.f32 0.5, %v287_v58  ;;  %v383_v20 = vadd.f32 -0.0013887316, %v375_v10  ;;  %v262_v23 = vsub.f32 %v246_v17, %v254_v12 }
  0xdc   : > { %v501_v13 = vsel %vm985_vm13, %v493_v2, %v437_v62  ;;  %v517_v14 = vsel %vm989_vm14, %v509_v3, %v445_v63  ;;  %v340_v15 = vmul.f32 %v332_v4, %v971_v11  ;;  %v270_v11 = vmul.f32 7.549782e-08, %v635_v36 }
  0xdd   : > { %525 = vst [vmem:[%s933_s30 + $0x50] sm:$0xff] %v501_v13  ;;  %533 = vst [vmem:[%s933_s30 + $0x58] sm:$0xff] %v517_v14  ;;  %v311_v5 = vmul.f32 %v303_v8, %v287_v58  ;;  %v391_v26 = vmul.f32 %v383_v20, %v287_v58  ;;  %vm484_vm1 = vcmp.eq.s32.totalorder %v476_v1, 2  ;;  %v367_v27 = vmul.f32 %v287_v58, %v287_v58 }
  0xde   : > { %v436_v21 = vsel %vm997_vm15, %v412_v7, %v340_v15  ;;  %v444_v22 = vsel %vm997_vm15, %v340_v15, %v412_v7  ;;  %v471_v28 = vadd.s32 1, %v660_v6  ;;  %v278_v29 = vsub.f32 %v262_v23, %v270_v11 }
  0xdf   : > { %v492_v40 = vsub.f32 0.0, %v436_v21  ;;  %v508_v24 = vsub.f32 0.0, %v444_v22  ;;  %v319_v25 = vadd.f32 -0.16666655, %v311_v5  ;;  %v399_v33 = vadd.f32 0.041666646, %v391_v26 }
  0xe0   : > { %v423_v16 = vand.u32 1, %v660_v6  ;;  %v286_v34 = vmul.f32 %v278_v29, %v278_v29  ;;  %v359_v37 = vsub.f32 1.0, %v351_v19  ;;  %v455_v44 = vand.u32 2, %v660_v6 }
  0xe1   : > { %v500_v30 = vsel %vm1013_vm0, %v492_v40, %v436_v21  ;;  %v516_v31 = vsel %vm484_vm1, %v508_v24, %v444_v22  ;;  %v327_v32 = vmul.f32 %v319_v25, %v287_v58  ;;  %v407_v38 = vmul.f32 %v399_v33, %v367_v27 }
  0xe2   : > { %524 = vst [vmem:[%s933_s30 + $0x40] sm:$0xff] %v500_v30  ;;  %532 = vst [vmem:[%s933_s30 + $0x48] sm:$0xff] %v516_v31  ;;  %v294_v41 = vmul.f32 -0.00019515296, %v286_v34  ;;  %v374_v42 = vmul.f32 2.4433157e-05, %v286_v34  ;;  %v657_v52 = vcvt.f32.s32 %v994_v48 }
  0xe3   : > { %v335_v35 = vadd.f32 1.0, %v327_v32  ;;  %v415_v43 = vadd.f32 %v407_v38, %v359_v37  ;;  %v479_v45 = vand.u32 2, %v471_v28  ;;  %vm431_vm2 = vcmp.eq.s32.totalorder %v423_v16, 1 }
  0xe4   : > { %v302_v46 = vadd.f32 0.008332161, %v294_v41  ;;  %v382_v49 = vadd.f32 -0.0013887316, %v374_v42  ;;  %vm463_vm3 = vcmp.eq.s32.totalorder %v455_v44, 2  ;;  %v350_v57 = vmul.f32 0.5, %v286_v34 }
  0xe5   : > { %v343_v9 = vmul.f32 %v335_v35, %v279_v53  ;;  %vm487_vm4 = vcmp.eq.s32.totalorder %v479_v45, 2  ;;  %v366_v53 = vmul.f32 %v286_v34, %v286_v34  ;;  %v470_v62 = vadd.s32 1, %v657_v52 }
  0xe6   : > { %v310_v36 = vmul.f32 %v302_v46, %v286_v34  ;;  %v390_v56 = vmul.f32 %v382_v49, %v286_v34  ;;  %v422_v48 = vand.u32 1, %v657_v52  ;;  %v358_v0 = vsub.f32 1.0, %v350_v57 }
  0xe7   : > { %v439_v50 = vsel %vm431_vm2, %v415_v43, %v343_v9  ;;  %v447_v51 = vsel %vm431_vm2, %v343_v9, %v415_v43  ;;  %v454_v3 = vand.u32 2, %v657_v52  ;;  %v478_v4 = vand.u32 2, %v470_v62 }
  0xe8   : > { %v495_v54 = vsub.f32 0.0, %v439_v50  ;;  %v511_v55 = vsub.f32 0.0, %v447_v51  ;;  %v318_v59 = vadd.f32 -0.16666655, %v310_v36  ;;  %v398_v60 = vadd.f32 0.041666646, %v390_v56 }
  0xe9   : > { %vm430_vm5 = vcmp.eq.s32.totalorder %v422_v48, 1  ;;  %vm462_vm6 = vcmp.eq.s32.totalorder %v454_v3, 2  ;;  %vm486_vm7 = vcmp.eq.s32.totalorder %v478_v4, 2 }
  0xea   : > { %v503_v39 = vsel %vm463_vm3, %v495_v54, %v439_v50  ;;  %v519_v58 = vsel %vm487_vm4, %v511_v55, %v447_v51  ;;  %v326_v1 = vmul.f32 %v318_v59, %v286_v34  ;;  %v406_v47 = vmul.f32 %v398_v60, %v366_v53 }
  0xeb   : > { %527 = vst [vmem:[%s933_s30 + $0x70] sm:$0xff] %v503_v39  ;;  %535 = vst [vmem:[%s933_s30 + $0x78] sm:$0xff] %v519_v58 }
  0xec   : > { %v334_v63 = vadd.f32 1.0, %v326_v1  ;;  %v414_v2 = vadd.f32 %v406_v47, %v358_v0 }
  0xee   : > { %v342_v61 = vmul.f32 %v334_v63, %v278_v29 }
  0xf0   : > { %v438_v6 = vsel %vm430_vm5, %v414_v2, %v342_v61  ;;  %v446_v7 = vsel %vm430_vm5, %v342_v61, %v414_v2 }
  0xf1   : > { %v494_v8 = vsub.f32 0.0, %v438_v6  ;;  %v510_v10 = vsub.f32 0.0, %v446_v7 }
  0xf3   : > { %v502_v12 = vsel %vm462_vm6, %v494_v8, %v438_v6  ;;  %v518_v13 = vsel %vm486_vm7, %v510_v10, %v446_v7 }
  0xf4   : > { %526 = vst [vmem:[%s933_s30 + $0x60] sm:$0xff] %v502_v12  ;;  %534 = vst [vmem:[%s933_s30 + $0x68] sm:$0xff] %v518_v13 }
  0xf5   : > { %718 = shalt.err (!%p715_p3)
}
  0xf6   : > { %s719_s21 = scalar_lea.hbm %s1033_s7, 2048  ;;  %s723_s24 = scalar_lea.hbm %s1084_s2, 4096 }
  0xf7   : > { %p720_p4 = scmp.ne.s32.totalorder %s1033_s7, %s719_s21  ;;  %p724_p9 = scmp.lt.u32.totalorder %s1033_s7, %s1084_s2 }
  0xf8   : > { %p725_p10 = scmp.lt.u32.totalorder %s723_s24, %s719_s21  ;;  %p727_p12 = scmp.lt.u32.totalorder %s719_s21, %s1033_s7 }
  0xf9   : > { %p721_p7 = pnand %p720_p4, %p826_p5 }
  0xfa   : > { %p726_p11 = por %p725_p10, %p724_p9 }
  0xfb   : > { %p722_p8 = pneg %p721_p7 }
  0xfc   : > { %p728_p13 = por %p727_p12, %p726_p11 }
  0xfe   : > { %p729_p0 = pnand %p728_p13, %p722_p8 }
 0x100   : > { %732 = shalt.err (!%p729_p0)
}
 0x101   : > { %s771_s27 = smov 256   ;;  %s772_s28 = smov 16  }
 0x102   : > { %661 = dma.vmem_to_hbm [thread:$0]  (%p826_p5), %s1035_s4, 2048, %s1033_s7, %s1041_s8, %s771_s27, %s771_s27, %s772_s28  }
 0x103 PF: > { %p667_p1 = scmp.ge.s32.totalorder %s767_s12, 2  ;;  %s566_s29 = sand.u32 1, %s755_s9  }
 0x104   : > { %s567_s30 = scalar_lea.sflag [#allocation3], %s566_s29 }
 0x105   : > { %p664_p2 = pnand %p667_p1, %p830_p6 }
 0x107   : > { %750 = dma.done.wait (!%p664_p2), %s567_s30, 2048  }
 0x108   : > { %752 = vsyncadd (!%p664_p2), %s567_s30, 4294965248  ;;  %p12_p3 = scmp.ge.s32.totalorder %s813_s15, 4   ;;  %s1113_s9 = smov %s759_s10 }
 0x109   : > { %s1114_s10 = smov %s763_s11  ;;  %s1115_s11 = smov %s824_s18 }
 0x10a   : > { %s1116_s12 = smov %s813_s15  ;;  %14 = sbr.rel (!%p12_p3) target bundleno = 3 (0x3), region = 63 }
 0x111   :  { %572 = vsyncpa [#allocation3], 1 }
 0x112   :  { %574 = vsyncpa [#allocation3 + $0x1], 1 }

</bundles_post_ra>
